<compile_context>
chip_gen: v5e
topology: v5e:2x2
jax: 0.10.0
libtpu: 0.0.40
codegen_flags: <defaults>
</compile_context>

<pallas_src>
import functools

import jax
import jax.numpy as jnp
from jax.experimental import pallas as pl
from jax.experimental.pallas import tpu as pltpu

_LANE = 128
_SUBLANE = 8


def _round_up(x, m):
    return (x + m - 1) // m * m


def _cdiv(a, b):
    return -(-a // b)


def _vmem_budgets():
    """(planning budget, compiler scoped limit) in bytes, per generation.

    The planning budget is what block sizing may consume (leaves slack for
    compiler temporaries); the scoped limit handed to Mosaic is higher so an
    extra block-sized temporary never turns a legal config into a compile
    failure.  v5e/v6e: 128 MiB physical; v7x: 64 MiB per TensorCore.
    """
    cap = None
    try:
        cap = getattr(pltpu.get_tpu_info(), "vmem_capacity_bytes", None)
    except Exception:
        cap = None
    if not cap or cap <= 0:
        cap = 64 * 1024 * 1024                      # conservative (v7x per-TC)
    plan = min(int(cap * 0.72), 100 * 1024 * 1024)
    limit = min(int(cap * 0.85), 120 * 1024 * 1024)
    return plan, max(limit, 32 * 1024 * 1024)


def _pick_rows_block(total_rows, row_bytes, target_bytes, min_block_bytes):
    """Rows per block: multiple of 8 (== total_rows when < 8), ~target_bytes
    of per-block input IO, preferring >= 2 grid steps (v7x megacore) but never
    shrinking a block below min_block_bytes (HBM roofline efficiency wins)."""
    if total_rows <= _SUBLANE:
        return total_rows
    max_rows = (total_rows // _SUBLANE) * _SUBLANE      # block dim <= array dim
    rows = (target_bytes // max(row_bytes, 1)) // _SUBLANE * _SUBLANE
    rows = int(min(max(rows, _SUBLANE), max_rows))
    while rows > _SUBLANE and _cdiv(total_rows, rows) < 2:
        cand = max(_SUBLANE, (rows // 2) // _SUBLANE * _SUBLANE)
        if cand * row_bytes < min_block_bytes:
            break
        rows = cand
    return rows


# --------------------------- fast path (one kernel) ---------------------------

def _cin_fused_kernel(x_ref, wb_ref, o_ref, *, eps, inv_n):
    # x_ref : (rows_blk, HW)  one row per (b, c) instance (full H*W extent).
    # wb_ref: (rows_blk, 2)   per-block tile: column 0 = weight, column 1 = bias.
    xf = x_ref[...].astype(jnp.float32)
    # Offset-compensated sums (per-row first sample) for numerical stability.
    c = xf[:, 0:1]
    s0 = jnp.sum(xf - c, axis=1, keepdims=True)
    s1 = jnp.sum((xf - c) * (xf - c), axis=1, keepdims=True)
    dmean = s0 * inv_n
    mean = c + dmean
    var = jnp.maximum(s1 * inv_n - dmean * dmean, 0.0)      # biased variance
    wb = wb_ref[...].astype(jnp.float32)
    scale = wb[:, 0:1] * jax.lax.rsqrt(var + eps)            # per-row scale
    shift = wb[:, 1:2] - mean * scale                        # per-row shift
    o_ref[...] = (xf * scale + shift).astype(o_ref.dtype)


# ----------------------- two-pass path (very large H*W) -----------------------

def _cin_stats_kernel(x_ref, stats_ref, s0_ref, s1_ref, *, hw_blk, hw_total):
    # grid = (row_blocks, hw_blocks); hw axis (last) is the 'arbitrary' reduction.
    j = pl.program_id(1)

    @pl.when(j == 0)
    def _():
        s0_ref[...] = jnp.zeros_like(s0_ref)
        s1_ref[...] = jnp.zeros_like(s1_ref)

    x = x_ref[...].astype(jnp.float32)
    if hw_total % hw_blk != 0:
        # Last HW block is ragged; loaded lanes beyond HW are undefined -> mask.
        col = jax.lax.broadcasted_iota(jnp.int32, x.shape, 1) + j * hw_blk
        x = jnp.where(col < hw_total, x, jnp.zeros_like(x))

    s0_ref[...] += jnp.sum(x, axis=1, keepdims=True)
    s1_ref[...] += jnp.sum(x * x, axis=1, keepdims=True)

    @pl.when(j == pl.num_programs(1) - 1)
    def _():
        # Single combined write of the (rows_blk, 2) output block.
        stats_ref[:, 0:1] = s0_ref[...]
        stats_ref[:, 1:2] = s1_ref[...]


def _cin_apply_kernel(x_ref, st_ref, o_ref):
    # st_ref: (rows_blk, 2) per-block tile; column 0 = s, column 1 = t
    st = st_ref[...]
    x = x_ref[...].astype(jnp.float32)
    o_ref[...] = (x * st[:, 0:1] + st[:, 1:2]).astype(o_ref.dtype)


# --------------------------------- wrapper ------------------------------------

def conditional_instance_norm_2d(x, y, scale_emb, shift_emb, *, eps=1e-5,
                                 target_block_bytes=4 << 20,
                                 force_two_pass=False):
    """x: (B, C, H, W) float; y: (B,) int indices into (num_d, C) embeddings."""
    B, C, H, W = x.shape
    BC, HW = B * C, H * W
    itemsize = jnp.dtype(x.dtype).itemsize
    inv_n = 1.0 / HW
    eps = float(eps)

    # Embedding lookups + per-instance affine params (plain JAX glue).
    weight = jnp.take(scale_emb, y, axis=0).reshape(BC)          # (BC,)
    bias = jnp.take(shift_emb, y, axis=0).reshape(BC)            # (BC,)
    wb = jnp.stack([weight, bias], axis=1).astype(jnp.float32)   # (BC, 2)

    x_flat = x.reshape(BC, HW)                                   # metadata-only

    plan_budget, vmem_limit = _vmem_budgets()
    target = min(int(target_block_bytes), max(plan_budget // 6, 1 << 20))

    # Per-element VMEM of one block: double-buffered in + out, plus an f32
    # working-set allowance (bf16 inputs also upcast to f32 in-kernel).
    per_elem = 4 * itemsize + (4 if itemsize >= 4 else 8)
    per_row_vmem = HW * per_elem + 2 * _LANE * 4      # + lane-padded wb row x2

    min_rows = BC if BC < _SUBLANE else _SUBLANE
    fast_ok = min_rows * per_row_vmem <= plan_budget
    two_pass = force_two_pass or not fast_ok

    if not two_pass:
        # ---------------- fast path: whole H*W row per block ----------------
        rows_blk = _pick_rows_block(BC, HW * itemsize, target,
                                    min_block_bytes=1 << 20)
        if BC >= _SUBLANE:
            rows_cap = max(_SUBLANE,
                           (plan_budget // per_row_vmem) // _SUBLANE * _SUBLANE)
            rows_blk = min(rows_blk, rows_cap)
        grid = (_cdiv(BC, rows_blk),)

        out = pl.pallas_call(
            functools.partial(_cin_fused_kernel, eps=eps, inv_n=inv_n),
            out_shape=jax.ShapeDtypeStruct((BC, HW), x.dtype),
            grid_spec=pltpu.PrefetchScalarGridSpec(
                num_scalar_prefetch=0,
                grid=grid,
                in_specs=[
                    pl.BlockSpec((rows_blk, HW), lambda i: (i, 0)),
                    pl.BlockSpec((rows_blk, 2), lambda i: (i, 0)),  # tiny per-step tile
                ],
                out_specs=pl.BlockSpec((rows_blk, HW), lambda i: (i, 0)),
            ),
            compiler_params=pltpu.CompilerParams(
                dimension_semantics=("parallel",),
                vmem_limit_bytes=vmem_limit,
            ),
        )(x_flat, wb)
        return out.reshape(B, C, H, W)

    # ------------- two-pass path: tile H*W as a reduction axis ---------------
    if HW <= _LANE:
        hw_blk = HW                                   # full-extent lane dim
    else:
        lane_budget = max(_LANE,
                          (target // (_SUBLANE * itemsize)) // _LANE * _LANE)
        hw_blk = max(_LANE, min(lane_budget, (HW // _LANE) * _LANE))
    n_hw = _cdiv(HW, hw_blk)

    rows_blk = _pick_rows_block(BC, hw_blk * itemsize, target,
                                min_block_bytes=256 << 10)
    per_row2 = hw_blk * (4 * itemsize + 4) + 2 * _LANE * 4
    if BC >= _SUBLANE:
        rows_cap = max(_SUBLANE,
                       (plan_budget // per_row2) // _SUBLANE * _SUBLANE)
        rows_blk = min(rows_blk, rows_cap)
    n_rows = _cdiv(BC, rows_blk)

    # Pass 1: per-row sum and sum-of-squares, accumulated in VMEM scratch and
    # written once on the last HW step.
    stats = pl.pallas_call(
        functools.partial(_cin_stats_kernel, hw_blk=hw_blk, hw_total=HW),
        out_shape=jax.ShapeDtypeStruct((BC, 2), jnp.float32),
        grid_spec=pltpu.PrefetchScalarGridSpec(
            num_scalar_prefetch=0,
            grid=(n_rows, n_hw),
            in_specs=[pl.BlockSpec((rows_blk, hw_blk), lambda i, j: (i, j))],
            out_specs=pl.BlockSpec((rows_blk, 2), lambda i, j: (i, 0)),
            scratch_shapes=[pltpu.VMEM((rows_blk, 1), jnp.float32),
                            pltpu.VMEM((rows_blk, 1), jnp.float32)],
        ),
        compiler_params=pltpu.CompilerParams(
            dimension_semantics=("parallel", "arbitrary"),
            vmem_limit_bytes=vmem_limit,
        ),
    )(x_flat)

    # Tiny per-row scale/shift math in plain JAX.
    # TODO(synk): stats here are plain (chunked) sums; extreme mean/std ratios
    # can still lose precision vs the offset-compensated fast path.
    mean = stats[:, 0:1] * inv_n
    var = jnp.maximum(stats[:, 1:2] * inv_n - mean * mean, 0.0)
    s = wb[:, 0:1] * jax.lax.rsqrt(var + eps)
    t = wb[:, 1:2] - mean * s
    st = jnp.concatenate([s, t], axis=1)                         # (BC, 2)

    # Pass 2: normalize.
    out = pl.pallas_call(
        _cin_apply_kernel,
        out_shape=jax.ShapeDtypeStruct((BC, HW), x.dtype),
        grid_spec=pltpu.PrefetchScalarGridSpec(
            num_scalar_prefetch=0,
            grid=(n_rows, n_hw),
            in_specs=[
                pl.BlockSpec((rows_blk, hw_blk), lambda i, j: (i, j)),
                pl.BlockSpec((rows_blk, 2), lambda i, j: (i, 0)),
            ],
            out_specs=pl.BlockSpec((rows_blk, hw_blk), lambda i, j: (i, j)),
        ),
        compiler_params=pltpu.CompilerParams(
            dimension_semantics=("parallel", "parallel"),
            vmem_limit_bytes=vmem_limit,
        ),
    )(x_flat, st)
    return out.reshape(B, C, H, W)


# ----------------------------------- demo -------------------------------------

def _reference(x, y, scale_emb, shift_emb, eps=1e-5):
    w = jnp.take(scale_emb, y, axis=0)[:, :, None, None]
    b = jnp.take(shift_emb, y, axis=0)[:, :, None, None]
    mean = jnp.mean(x, axis=(2, 3), keepdims=True)
    var = jnp.mean((x - mean) ** 2, axis=(2, 3), keepdims=True)
    return (x - mean) / jnp.sqrt(var + eps) * w + b


if __name__ == "__main__":
    num_d = 2
    key = jax.random.PRNGKey(0)

    configs = [
        # (B, C, H, W, extra kwargs)
        (2, 4, 16, 16, {}),                                                   # fast path
        (2, 4, 16, 16, dict(force_two_pass=True, target_block_bytes=4096)),   # two-pass path
        (3, 4, 10, 10, {}),                                                   # ragged rows + non-128 H*W
    ]

    for (B, C, H, W, kwargs) in configs:
        key, kx, ks, kh, ky = jax.random.split(key, 5)
        x = jax.random.normal(kx, (B, C, H, W), dtype=jnp.float32)
        scale_emb = jax.random.normal(ks, (num_d, C), dtype=jnp.float32)  # nn.Embedding ~ N(0,1)
        shift_emb = jax.random.normal(kh, (num_d, C), dtype=jnp.float32)
        y = jax.random.randint(ky, (B,), 0, num_d)

        out = conditional_instance_norm_2d(x, y, scale_emb, shift_emb, **kwargs)
        out = jax.block_until_ready(out)

        ref = _reference(x, y, scale_emb, shift_emb)
        assert out.shape == (B, C, H, W)
        assert jnp.allclose(out, ref, atol=1e-4, rtol=1e-4), \
            f"mismatch vs reference for shape {(B, C, H, W)} kwargs={kwargs}"

    print("KERNEL_OK")
</pallas_src>

<mosaic_0001>
module attributes {stable_mosaic.version = 11 : i64} {
  func.func @_cin_fused_kernel(%arg0: i32, %arg1: memref<8x256xf32, #tpu.memory_space<vmem>>, %arg2: memref<8x2xf32, #tpu.memory_space<vmem>>, %arg3: memref<8x256xf32, #tpu.memory_space<vmem>>) attributes {dimension_semantics = [#tpu.dimension_semantics<parallel>], iteration_bounds = array<i64: 1>, scalar_prefetch = 0 : i64, scratch_operands = 0 : i64, tpu.core_type = #tpu.core_type<tc>, window_params = [{transform_indices = @transform_0, window_bounds = array<i64: 8, 256>}, {transform_indices = @transform_1, window_bounds = array<i64: 8, 2>}, {transform_indices = @transform_2, window_bounds = array<i64: 8, 256>}]} {
    %c0 = arith.constant 0 : index
    %c0_0 = arith.constant 0 : index
    %0 = vector.load %arg1[%c0, %c0_0] : memref<8x256xf32, #tpu.memory_space<vmem>>, vector<8x256xf32>
    %1 = vector.extract_strided_slice %0 {offsets = [0, 0], sizes = [8, 1], strides = [1, 1]} : vector<8x256xf32> to vector<8x1xf32>
    %2 = vector.broadcast %1 : vector<8x1xf32> to vector<8x256xf32>
    %3 = arith.subf %0, %2 : vector<8x256xf32>
    %cst = arith.constant dense<0.000000e+00> : vector<8xf32>
    %4 = vector.multi_reduction <add>, %3, %cst [1] : vector<8x256xf32> to vector<8xf32>
    %5 = vector.shape_cast %4 : vector<8xf32> to vector<8x1xf32>
    %6 = vector.broadcast %1 : vector<8x1xf32> to vector<8x256xf32>
    %7 = arith.subf %0, %6 : vector<8x256xf32>
    %8 = vector.broadcast %1 : vector<8x1xf32> to vector<8x256xf32>
    %9 = arith.subf %0, %8 : vector<8x256xf32>
    %10 = arith.mulf %7, %9 : vector<8x256xf32>
    %cst_1 = arith.constant dense<0.000000e+00> : vector<8xf32>
    %11 = vector.multi_reduction <add>, %10, %cst_1 [1] : vector<8x256xf32> to vector<8xf32>
    %12 = vector.shape_cast %11 : vector<8xf32> to vector<8x1xf32>
    %cst_2 = arith.constant 3.906250e-03 : f32
    %13 = vector.broadcast %cst_2 : f32 to vector<8x1xf32>
    %14 = arith.mulf %5, %13 : vector<8x1xf32>
    %15 = arith.addf %1, %14 : vector<8x1xf32>
    %cst_3 = arith.constant 3.906250e-03 : f32
    %16 = vector.broadcast %cst_3 : f32 to vector<8x1xf32>
    %17 = arith.mulf %12, %16 : vector<8x1xf32>
    %18 = arith.mulf %14, %14 : vector<8x1xf32>
    %19 = arith.subf %17, %18 : vector<8x1xf32>
    %cst_4 = arith.constant 0.000000e+00 : f32
    %20 = vector.broadcast %cst_4 : f32 to vector<8x1xf32>
    %21 = arith.maximumf %19, %20 : vector<8x1xf32>
    %c0_5 = arith.constant 0 : index
    %c0_6 = arith.constant 0 : index
    %22 = vector.load %arg2[%c0_5, %c0_6] : memref<8x2xf32, #tpu.memory_space<vmem>>, vector<8x2xf32>
    %23 = vector.extract_strided_slice %22 {offsets = [0, 0], sizes = [8, 1], strides = [1, 1]} : vector<8x2xf32> to vector<8x1xf32>
    %cst_7 = arith.constant 9.99999974E-6 : f32
    %24 = vector.broadcast %cst_7 : f32 to vector<8x1xf32>
    %25 = arith.addf %21, %24 : vector<8x1xf32>
    %26 = math.rsqrt %25 : vector<8x1xf32>
    %27 = arith.mulf %23, %26 : vector<8x1xf32>
    %28 = vector.extract_strided_slice %22 {offsets = [0, 1], sizes = [8, 1], strides = [1, 1]} : vector<8x2xf32> to vector<8x1xf32>
    %29 = arith.mulf %15, %27 : vector<8x1xf32>
    %30 = arith.subf %28, %29 : vector<8x1xf32>
    %31 = vector.broadcast %27 : vector<8x1xf32> to vector<8x256xf32>
    %32 = arith.mulf %0, %31 : vector<8x256xf32>
    %33 = vector.broadcast %30 : vector<8x1xf32> to vector<8x256xf32>
    %34 = arith.addf %32, %33 : vector<8x256xf32>
    %c0_8 = arith.constant 0 : index
    %c0_9 = arith.constant 0 : index
    %35 = vector.load %arg3[%c0_8, %c0_9] : memref<8x256xf32, #tpu.memory_space<vmem>>, vector<8x256xf32>
    tpu.vector_store %arg3[%c0_8, %c0_9], %34 {strides = array<i32>} : memref<8x256xf32, #tpu.memory_space<vmem>>, vector<8x256xf32>,
    return
  }
  func.func @transform_0(%arg0: i32) -> (i32, i32) {
    %c0_i32 = arith.constant 0 : i32
    %c0_i32_0 = arith.constant 0 : i32
    return %arg0, %c0_i32 : i32, i32
  }
  func.func @transform_1(%arg0: i32) -> (i32, i32) {
    %c0_i32 = arith.constant 0 : i32
    %c0_i32_0 = arith.constant 0 : i32
    return %arg0, %c0_i32 : i32, i32
  }
  func.func @transform_2(%arg0: i32) -> (i32, i32) {
    %c0_i32 = arith.constant 0 : i32
    %c0_i32_0 = arith.constant 0 : i32
    return %arg0, %c0_i32 : i32, i32
  }
}

</mosaic_0001>

<bundles_post_ra>
// kernel: tpu_custom_call.1
= control target key start
LH: loop header
LB: loop body
LE: loop exit
PB: predicated region body
PF: predicated region fallthrough
CT: control target
= control target key end

     0   :  { %7 = vsyncpa [#allocation3], 0  ;;  %s193_s0 = inlined_call_operand.hbm [shape: f32[8,256], index: 0, kind: input, shape index: {}]   ;;  %s194_s1 = inlined_call_operand.vmem [shape: f32[8,2], index: 1, kind: input, shape index: {}]   ;;  %s195_s2 = inlined_call_operand.hbm [shape: f32[8,256], index: 2, kind: output, shape index: {}]  }
   0x1   :  { %8 = vsyncpa [#allocation4], 0  ;;  %s14_s11 = sshll.u32 %s193_s0, 4  ;;  %s164_s12 = smov [#allocation2]   ;;  %s15_s11 = int_to_ptr.hbm [resolvable:$true] %s14_s11 }
   0x2   :  { %s16_s13 = sshll.u32 %s164_s12, 4  ;;  %s17_s13 = int_to_ptr.vmem [resolvable:$true] %s16_s13 }
   0x3   :  { %19 = dma.hbm_to_vmem [thread:$0]  %s15_s11, 256, %s17_s13, [#allocation3]  }
   0x4   :  { %160 = dma.done.wait [#allocation3], 256  }
   0x5   :  { %161 = vsyncadd [#allocation3], 4294967040  ;;  %v165_v0 = vmov 0   ;;  %v26_v1 = vld [vmem:[#allocation2] sm:$0xff]  ;;  %v27_v2 = vld [vmem:[#allocation2 + $0x8] sm:$0xff]  ;;  %s166_s15 = smov 1  }
   0x6   :  { %106 = vset.pattern.permute.xlu0 %v165_v0  ;;  %107 = vset.pattern.permute.xlu2 %v165_v0  ;;  %v49_v23 = vld [vmem:[%s194_s1] sm:$0xff]  ;;  %v167_v29 = vmov 1   ;;  %s168_s1 = smov [#allocation5]   ;;  %s91_s19 = sshll.u32 %s195_s2, 4  ;;  %s92_s19 = int_to_ptr.hbm [resolvable:$true] %s91_s19 }
   0x7   :  { %30 = vperm.xlu0 %106, %v26_v1   ;;  %s89_s16 = sshll.u32 %s168_s1, 4  ;;  %s90_s16 = int_to_ptr.vmem [resolvable:$true] %s89_s16 }
   0xf   :  { %109 = vset.pattern.permute.xlu0 %v167_v29 }
  0x79   :  { %v31_v3 = vpop.permute.xlu0 %30 }
  0x7a   :  { %v33_v4 = vsub.f32 %v26_v1, %v31_v3  ;;  %v34_v5 = vsub.f32 %v27_v2, %v31_v3 }
  0x7c   :  { %v35_v6 = vadd.f32 %v34_v5, %v33_v4  ;;  %v38_v7 = vmul.f32 %v33_v4, %v33_v4  ;;  %v39_v8 = vmul.f32 %v34_v5, %v34_v5 }
  0x7e   :  { %36 = vadd.xlane.f32.xlu0 %v35_v6  ;;  %v40_v9 = vadd.f32 %v39_v8, %v38_v7 }
  0x80   :  { %41 = vadd.xlane.f32.xlu1 %v40_v9 }
  0xf1   :  { %v37_v10 = vpop.xlane.xlu0 %36 }
  0xf2   :  { %v43_v11 = vmul.f32 0.00390625, %v37_v10 }
  0xf3   :  { %v42_v12 = vpop.xlane.xlu1 %41 }
  0xf4   :  { %v46_v13 = vmul.f32 %v43_v11, %v43_v11  ;;  %v45_v14 = vmul.f32 0.00390625, %v42_v12  ;;  %v44_v26 = vadd.f32 %v43_v11, %v26_v1 }
  0xf6   :  { %v47_v15 = vsub.f32 %v45_v14, %v46_v13 }
  0xf8   :  { %v48_v16 = vmax.f32 %v47_v15, 0.0 }
  0xfa   :  { %v50_v17 = vadd.f32 1e-05, %v48_v16 }
  0xfc   :  { %110 = vrsqrt.f32 %v50_v17  ;;  %vm57_vm1 = vweird.f32 %v50_v17 }
 0x102   :  { %v111_v18 = vpop.eup %110 }
 0x103   :  { %v52_v19 = vmul.f32 %v111_v18, %v50_v17  ;;  %vm58_vm0 = vweird.f32 %v111_v18 }
 0x104   :  { %vm59_vm2 = vmor %vm57_vm1, %vm58_vm0 }
 0x105   :  { %v53_v20 = vmul.f32 %v111_v18, %v52_v19 }
 0x107   :  { %v54_v21 = vmul.f32 0.5, %v53_v20 }
 0x109   :  { %v55_v22 = vsub.f32 1.5, %v54_v21 }
 0x10b   :  { %v56_v24 = vmul.f32 %v111_v18, %v55_v22 }
 0x10d   :  { %v60_v25 = vsel %vm59_vm2, %v111_v18, %v56_v24 }
 0x10e   :  { %v61_v27 = vmul.f32 %v60_v25, %v49_v23 }
 0x110   :  { %70 = vperm.xlu2 %107, %v61_v27   ;;  %v62_v28 = vmul.f32 %v61_v27, %v44_v26 }
 0x112   :  { %64 = vrot.lane.b32.xlu1 %v62_v28, %s166_s15 }
 0x118   :  { %108 = vset.pattern.permute.xlu2 %v167_v29 }
 0x16a   :  { %v71_v32 = vpop.permute.xlu2 %70 }
 0x16b   :  { %v73_v33 = vmul.f32 %v71_v32, %v26_v1  ;;  %v74_v34 = vmul.f32 %v71_v32, %v27_v2 }
 0x184   :  { %v65_v30 = vpop.permute.xlu1 %64 }
 0x185   :  { %v67_v31 = vsub.f32 %v49_v23, %v65_v30 }
 0x187   :  { %77 = vperm.xlu2 %108, %v67_v31  }
 0x1e1   :  { %v78_v35 = vpop.permute.xlu2 %77 }
 0x1e2   :  { %v80_v36 = vadd.f32 %v78_v35, %v73_v33  ;;  %v81_v37 = vadd.f32 %v78_v35, %v74_v34 }
 0x1e4   :  { %82 = vst [vmem:[#allocation5] sm:$0xff] %v80_v36 }
 0x1e5   :  { %83 = vst [vmem:[#allocation5 + $0x8] sm:$0xff] %v81_v37 }
 0x1e6   :  { %94 = dma.vmem_to_hbm [thread:$0]  %s90_s16, 256, %s92_s19, [#allocation4]  }
 0x1e7   :  { %162 = dma.done.wait [#allocation4], 256  }
 0x1e8   :  { %163 = vsyncadd [#allocation4], 4294967040 }
 0x1e9   :  { %99 = vsyncpa [#allocation3], 1 }
 0x1ea   :  { %100 = vsyncpa [#allocation4], 1 }

</bundles_post_ra>
